<compile_context>
chip_gen: v7x
topology: tpu7x:2x2x1
jax: 0.10.0
libtpu: 0.0.40
codegen_flags: <defaults>
</compile_context>

<pallas_src>
import functools

import jax
import jax.numpy as jnp
from jax.experimental import pallas as pl
from jax.experimental.pallas import tpu as pltpu


# ----------------------------------------------------------------------------
# Pallas kernel: per-channel spatial sum + max (streamed reduction)
# ----------------------------------------------------------------------------

def _pool_kernel(x_ref, sum_ref, max_ref, sum_sc, max_sc, *, hw, ts, needs_mask):
    """One (batch, channel-chunk, spatial-tile) grid step.

    x_ref   : (1, c_blk, ts) activation tile (C on sublanes, spatial on lanes)
    sum_ref : (1, c_blk, 1)  per-channel spatial sum for this (image, chunk)
    max_ref : (1, c_blk, 1)  per-channel spatial max for this (image, chunk)
    sum_sc  : (c_blk, 1) f32 running sum  (VMEM scratch, lives across s)
    max_sc  : (c_blk, 1) f32 running max  (VMEM scratch, lives across s)
    """
    s = pl.program_id(2)

    @pl.when(s == 0)
    def _init():
        sum_sc[...] = jnp.zeros_like(sum_sc)
        max_sc[...] = jnp.full_like(max_sc, -jnp.inf)

    x = x_ref[0].astype(jnp.float32)                        # (c_blk, ts)

    if needs_mask:
        # Tail tile: lanes >= (hw - s*ts) are out-of-bounds garbage.
        lane = jax.lax.broadcasted_iota(jnp.int32, x.shape, 1)
        valid = lane < (hw - s * ts)
        x_sum = jnp.where(valid, x, 0.0)
        x_max = jnp.where(valid, x, -jnp.inf)
    else:
        x_sum = x
        x_max = x

    sum_sc[...] = sum_sc[...] + jnp.sum(x_sum, axis=1, keepdims=True)
    max_sc[...] = jnp.maximum(max_sc[...], jnp.max(x_max, axis=1, keepdims=True))

    @pl.when(s == pl.num_programs(2) - 1)
    def _finalize():
        sum_ref[0] = sum_sc[...]
        max_ref[0] = max_sc[...]


# ----------------------------------------------------------------------------
# Tiling heuristics
# ----------------------------------------------------------------------------

def _choose_channel_block(C):
    """Channel chunk size: split large C so the channel grid axis can also be
    'parallel' (megacore). Chunks must keep a multiple-of-8 sublane block."""
    for cb in (256, 128, 64):
        if C > cb and C % cb == 0:
            return cb
    return C


def _choose_spatial_tile(c_blk, hw, dtype_bytes, block_budget_bytes):
    """Largest spatial tile such that one (c_blk, ts) block stays within the
    VMEM byte budget.  ts is either the full hw (single step per image/chunk)
    or a multiple of 128 (lane-aligned, tail tile masked via cdiv grid)."""
    max_ts = max(128, block_budget_bytes // (c_blk * dtype_bytes))
    if hw <= max_ts:
        return hw                     # whole image in one block, no masking
    return max(128, (max_ts // 128) * 128)


# ----------------------------------------------------------------------------
# Wrapper: pooling kernel + tiny shared MLP (in plain JAX) + sigmoid
# ----------------------------------------------------------------------------

def channel_attention(x_nchw, w1, w2, *, block_budget_bytes=4 * 1024 * 1024):
    """CBAM ChannelAttention forward.

    x_nchw : (N, C, H, W) activations (f32 or bf16)
    w1     : (C//16, C)  fc1 weight (PyTorch Conv2d(C, C//16, 1).weight squeezed)
    w2     : (C, C//16)  fc2 weight
    returns: (N, C, 1, 1) attention in [0, 1], dtype of x
    """
    N, C, H, W = x_nchw.shape
    hw = H * W
    x = x_nchw.reshape(N, C, hw)       # free reshape, keeps NCHW memory layout

    c_blk = _choose_channel_block(C)
    ts = _choose_spatial_tile(c_blk, hw, x.dtype.itemsize, block_budget_bytes)
    n_c = C // c_blk
    n_s = pl.cdiv(hw, ts)
    needs_mask = (hw % ts) != 0

    kernel = functools.partial(_pool_kernel, hw=hw, ts=ts, needs_mask=needs_mask)

    sum_out, max_out = pl.pallas_call(
        kernel,
        out_shape=(
            jax.ShapeDtypeStruct((N, C, 1), jnp.float32),
            jax.ShapeDtypeStruct((N, C, 1), jnp.float32),
        ),
        grid_spec=pltpu.PrefetchScalarGridSpec(
            num_scalar_prefetch=0,
            grid=(N, n_c, n_s),
            in_specs=[
                pl.BlockSpec((1, c_blk, ts), lambda n, c, s: (n, c, s)),
            ],
            out_specs=[
                pl.BlockSpec((1, c_blk, 1), lambda n, c, s: (n, c, 0)),
                pl.BlockSpec((1, c_blk, 1), lambda n, c, s: (n, c, 0)),
            ],
            scratch_shapes=[
                pltpu.VMEM((c_blk, 1), jnp.float32),   # running sum
                pltpu.VMEM((c_blk, 1), jnp.float32),   # running max
            ],
        ),
        compiler_params=pltpu.CompilerParams(
            dimension_semantics=("parallel", "parallel", "arbitrary"),
        ),
    )(x)

    # Tiny shared MLP + sigmoid in plain JAX (negligible cost; keeps the
    # Pallas kernel a pure streaming reduction). Fused across avg/max branches.
    avg = sum_out[..., 0] * (1.0 / float(hw))                     # (N, C) f32
    mx = max_out[..., 0]                                          # (N, C) f32
    stacked = jnp.concatenate([avg, mx], axis=0)                  # (2N, C)
    h = jnp.maximum(stacked @ w1.astype(jnp.float32).T, 0.0)      # (2N, r)
    y = (h @ w2.astype(jnp.float32).T).reshape(2, N, C)           # (2, N, C)
    att = jax.nn.sigmoid(y[0] + y[1])                             # (N, C)
    return att.reshape(N, C, 1, 1).astype(x_nchw.dtype)


# ----------------------------------------------------------------------------
# Pure-JAX reference (mirrors the PyTorch module)
# ----------------------------------------------------------------------------

def channel_attention_ref(x, w1, w2):
    xf = x.astype(jnp.float32)
    avg = jnp.mean(xf, axis=(2, 3))                     # (N, C)
    mx = jnp.max(xf, axis=(2, 3))                       # (N, C)

    def mlp(v):
        return jnp.maximum(v @ w1.T, 0.0) @ w2.T

    att = jax.nn.sigmoid(mlp(avg) + mlp(mx))
    return att[:, :, None, None]


# ----------------------------------------------------------------------------

if __name__ == "__main__":
    key = jax.random.PRNGKey(0)
    kx, k1, k2, kx2 = jax.random.split(key, 4)

    # Primary shape: in_planes=64 (module hard-codes hidden = in_planes // 16 = 4).
    N, C, H, W = 2, 64, 16, 16
    r = C // 16
    x = jax.random.normal(kx, (N, C, H, W), jnp.float32)
    w1 = jax.random.normal(k1, (r, C), jnp.float32) / (C ** 0.5)
    w2 = jax.random.normal(k2, (C, r), jnp.float32) / (r ** 0.5)

    out = jax.block_until_ready(jax.jit(channel_attention)(x, w1, w2))
    ref = channel_attention_ref(x, w1, w2)
    assert out.shape == (N, C, 1, 1), out.shape
    assert bool(jnp.all(jnp.isfinite(out))), "non-finite output"
    assert bool(jnp.all((out >= 0.0) & (out <= 1.0))), "sigmoid output out of range"
    err = float(jnp.max(jnp.abs(out.astype(jnp.float32) - ref)))
    assert err < 1e-4, f"primary-path mismatch vs reference, max abs err {err}"

    # Secondary check: non-multiple-of-128 spatial size with a tiny VMEM budget,
    # forcing the streaming + masked-tail-tile (cdiv grid) path.
    H2, W2 = 17, 19
    x2 = jax.random.normal(kx2, (1, C, H2, W2), jnp.float32)
    f2 = jax.jit(functools.partial(channel_attention, block_budget_bytes=32 * 1024))
    out2 = jax.block_until_ready(f2(x2, w1, w2))
    ref2 = channel_attention_ref(x2, w1, w2)
    err2 = float(jnp.max(jnp.abs(out2.astype(jnp.float32) - ref2)))
    assert err2 < 1e-4, f"masked-path mismatch vs reference, max abs err {err2}"

    print("KERNEL_OK")
</pallas_src>

<mosaic_0001>
module attributes {stable_mosaic.version = 11 : i64} {
  func.func @_pool_kernel(%arg0: i32, %arg1: i32, %arg2: i32, %arg3: memref<1x64x256xf32, #tpu.memory_space<vmem>>, %arg4: memref<1x64x1xf32, #tpu.memory_space<vmem>>, %arg5: memref<1x64x1xf32, #tpu.memory_space<vmem>>, %arg6: memref<64x1xf32, #tpu.memory_space<vmem>>, %arg7: memref<64x1xf32, #tpu.memory_space<vmem>>) attributes {dimension_semantics = [#tpu.dimension_semantics<parallel>, #tpu.dimension_semantics<parallel>, #tpu.dimension_semantics<arbitrary>], iteration_bounds = array<i64: 2, 1, 1>, scalar_prefetch = 0 : i64, scratch_operands = 2 : i64, tpu.core_type = #tpu.core_type<tc>, window_params = [{transform_indices = @transform_0, window_bounds = array<i64: 1, 64, 256>}, {transform_indices = @transform_1, window_bounds = array<i64: 1, 64, 1>}, {transform_indices = @transform_2, window_bounds = array<i64: 1, 64, 1>}]} {
    %c0_i32 = arith.constant 0 : i32
    %0 = arith.cmpi eq, %arg2, %c0_i32 : i32
    %1 = arith.extui %0 : i1 to i32
    %c0_i32_0 = arith.constant 0 : i32
    %2 = arith.cmpi ne, %1, %c0_i32_0 : i32
    scf.if %2 {
      %cst_14 = arith.constant 0.000000e+00 : f32
      %18 = vector.broadcast %cst_14 : f32 to vector<64x1xf32>
      %c0_15 = arith.constant 0 : index
      %c0_16 = arith.constant 0 : index
      %19 = vector.load %arg6[%c0_15, %c0_16] : memref<64x1xf32, #tpu.memory_space<vmem>>, vector<64x1xf32>
      tpu.vector_store %arg6[%c0_15, %c0_16], %18 {strides = array<i32>} : memref<64x1xf32, #tpu.memory_space<vmem>>, vector<64x1xf32>,
      %cst_17 = arith.constant 0xFF800000 : f32
      %20 = vector.broadcast %cst_17 : f32 to vector<64x1xf32>
      %c0_18 = arith.constant 0 : index
      %c0_19 = arith.constant 0 : index
      %21 = vector.load %arg7[%c0_18, %c0_19] : memref<64x1xf32, #tpu.memory_space<vmem>>, vector<64x1xf32>
      tpu.vector_store %arg7[%c0_18, %c0_19], %20 {strides = array<i32>} : memref<64x1xf32, #tpu.memory_space<vmem>>, vector<64x1xf32>,
    } else {
    }
    %c0 = arith.constant 0 : index
    %c0_1 = arith.constant 0 : index
    %c0_2 = arith.constant 0 : index
    %3 = vector.load %arg3[%c0, %c0_1, %c0_2] : memref<1x64x256xf32, #tpu.memory_space<vmem>>, vector<1x64x256xf32>
    %4 = vector.shape_cast %3 : vector<1x64x256xf32> to vector<64x256xf32>
    %c0_3 = arith.constant 0 : index
    %c0_4 = arith.constant 0 : index
    %5 = vector.load %arg6[%c0_3, %c0_4] : memref<64x1xf32, #tpu.memory_space<vmem>>, vector<64x1xf32>
    %cst = arith.constant dense<0.000000e+00> : vector<64xf32>
    %6 = vector.multi_reduction <add>, %4, %cst [1] : vector<64x256xf32> to vector<64xf32>
    %7 = vector.shape_cast %6 : vector<64xf32> to vector<64x1xf32>
    %8 = arith.addf %5, %7 : vector<64x1xf32>
    %c0_5 = arith.constant 0 : index
    %c0_6 = arith.constant 0 : index
    %9 = vector.load %arg6[%c0_5, %c0_6] : memref<64x1xf32, #tpu.memory_space<vmem>>, vector<64x1xf32>
    tpu.vector_store %arg6[%c0_5, %c0_6], %8 {strides = array<i32>} : memref<64x1xf32, #tpu.memory_space<vmem>>, vector<64x1xf32>,
    %c0_7 = arith.constant 0 : index
    %c0_8 = arith.constant 0 : index
    %10 = vector.load %arg7[%c0_7, %c0_8] : memref<64x1xf32, #tpu.memory_space<vmem>>, vector<64x1xf32>
    %cst_9 = arith.constant dense<0xFF800000> : vector<64xf32>
    %11 = vector.multi_reduction <maximumf>, %4, %cst_9 [1] : vector<64x256xf32> to vector<64xf32>
    %12 = vector.shape_cast %11 : vector<64xf32> to vector<64x1xf32>
    %13 = arith.maximumf %10, %12 : vector<64x1xf32>
    %c0_10 = arith.constant 0 : index
    %c0_11 = arith.constant 0 : index
    %14 = vector.load %arg7[%c0_10, %c0_11] : memref<64x1xf32, #tpu.memory_space<vmem>>, vector<64x1xf32>
    tpu.vector_store %arg7[%c0_10, %c0_11], %13 {strides = array<i32>} : memref<64x1xf32, #tpu.memory_space<vmem>>, vector<64x1xf32>,
    %c0_i32_12 = arith.constant 0 : i32
    %15 = arith.cmpi eq, %arg2, %c0_i32_12 : i32
    %16 = arith.extui %15 : i1 to i32
    %c0_i32_13 = arith.constant 0 : i32
    %17 = arith.cmpi ne, %16, %c0_i32_13 : i32
    scf.if %17 {
      %c0_14 = arith.constant 0 : index
      %c0_15 = arith.constant 0 : index
      %18 = vector.load %arg6[%c0_14, %c0_15] : memref<64x1xf32, #tpu.memory_space<vmem>>, vector<64x1xf32>
      %c0_16 = arith.constant 0 : index
      %c0_17 = arith.constant 0 : index
      %c0_18 = arith.constant 0 : index
      %19 = vector.load %arg4[%c0_16, %c0_17, %c0_18] : memref<1x64x1xf32, #tpu.memory_space<vmem>>, vector<1x64x1xf32>
      %20 = vector.shape_cast %19 : vector<1x64x1xf32> to vector<64x1xf32>
      %21 = vector.shape_cast %18 : vector<64x1xf32> to vector<1x64x1xf32>
      tpu.vector_store %arg4[%c0_16, %c0_17, %c0_18], %21 {strides = array<i32>} : memref<1x64x1xf32, #tpu.memory_space<vmem>>, vector<1x64x1xf32>,
      %c0_19 = arith.constant 0 : index
      %c0_20 = arith.constant 0 : index
      %22 = vector.load %arg7[%c0_19, %c0_20] : memref<64x1xf32, #tpu.memory_space<vmem>>, vector<64x1xf32>
      %c0_21 = arith.constant 0 : index
      %c0_22 = arith.constant 0 : index
      %c0_23 = arith.constant 0 : index
      %23 = vector.load %arg5[%c0_21, %c0_22, %c0_23] : memref<1x64x1xf32, #tpu.memory_space<vmem>>, vector<1x64x1xf32>
      %24 = vector.shape_cast %23 : vector<1x64x1xf32> to vector<64x1xf32>
      %25 = vector.shape_cast %22 : vector<64x1xf32> to vector<1x64x1xf32>
      tpu.vector_store %arg5[%c0_21, %c0_22, %c0_23], %25 {strides = array<i32>} : memref<1x64x1xf32, #tpu.memory_space<vmem>>, vector<1x64x1xf32>,
    } else {
    }
    return
  }
  func.func @transform_0(%arg0: i32, %arg1: i32, %arg2: i32) -> (i32, i32, i32) {
    %c0_i32 = arith.constant 0 : i32
    return %arg0, %arg1, %arg2 : i32, i32, i32
  }
  func.func @transform_1(%arg0: i32, %arg1: i32, %arg2: i32) -> (i32, i32, i32) {
    %c0_i32 = arith.constant 0 : i32
    %c0_i32_0 = arith.constant 0 : i32
    return %arg0, %arg1, %c0_i32 : i32, i32, i32
  }
  func.func @transform_2(%arg0: i32, %arg1: i32, %arg2: i32) -> (i32, i32, i32) {
    %c0_i32 = arith.constant 0 : i32
    %c0_i32_0 = arith.constant 0 : i32
    return %arg0, %arg1, %c0_i32 : i32, i32, i32
  }
}

</mosaic_0001>

<bundles_post_ra>
// kernel: channel_attention.1
= control target key start
LH: loop header
LB: loop body
LE: loop exit
PB: predicated region body
PF: predicated region fallthrough
CT: control target
= control target key end

     0   :  { %s631_s9 = smov 0   ;;  %s633_s10 = smov 0   ;;  %s743_s0 = inlined_call_operand.vmem [shape: f32[2,64,256], index: 0, kind: input, shape index: {}]   ;;  %s744_s1 = inlined_call_operand.vmem [shape: f32[2,64,1], index: 1, kind: output, shape index: {0}]   ;;  %s745_s2 = inlined_call_operand.vmem [shape: f32[2,64,1], index: 2, kind: output, shape index: {1}]  }
   0x1   :  { %s635_s11 = smov 0  }
   0x2 LB: > { %s32_s12 = sadd.s32 1, %s608_s10  ;;  %p552_p0 = scmp.ge.s32.totalorder %s612_s11, 1  ;;  %s612_s11 = sphi %s635_s11, %s13_s11   ;;  %s608_s10 = sphi %s633_s10, %s747_s10   ;;  %s604_s9 = sphi %s631_s9, %s746_s9  }
   0x3   : > { %p34_p1 = scmp.ge.s32.totalorder %s32_s12, 2  ;;  %p153_p2 = scmp.lt.s32.totalorder %s612_s11, 3 }
   0x5   : > { %s749_s12 = smov (%p34_p1, %s32_s12), 0  ;;  %p154_p3 = pnand %p552_p0, %p153_p2 }
   0x6   : > { %p199_p4 = scmp.lt.s32.totalorder (!%p154_p3), %s604_s9, 1  ;;  %vm237_vm0 = vcmask (!%p154_p3), 7168   ;;  %v614_v0 = vmov (!%p154_p3), 0.0   ;;  %v615_v31 = vmov (!%p154_p3), -inf  }
   0x7   : > { %157 = sbr.rel (%p154_p3) target bundleno = 202 (0xca), region = 24  ;;  %240 = vst.msk [vmem:[#allocation2 + $0x10] sm:$0xff] (!%p154_p3), %vm237_vm0, %v614_v0  ;;  %238 = vst.msk [vmem:[#allocation2] sm:$0xff] (!%p154_p3), %vm237_vm0, %v614_v0 }
   0x8   : > { %239 = vst.msk [vmem:[#allocation2 + $0x8] sm:$0xff] (!%p154_p3), %vm237_vm0, %v614_v0  ;;  %241 = vst.msk [vmem:[#allocation2 + $0x18] sm:$0xff] (!%p154_p3), %vm237_vm0, %v614_v0 }
   0x9   : > { %242 = vst.msk [vmem:[#allocation2 + $0x20] sm:$0xff] (!%p154_p3), %vm237_vm0, %v614_v0  ;;  %243 = vst.msk [vmem:[#allocation2 + $0x28] sm:$0xff] (!%p154_p3), %vm237_vm0, %v614_v0 }
   0xa   : > { %244 = vst.msk [vmem:[#allocation2 + $0x30] sm:$0xff] (!%p154_p3), %vm237_vm0, %v614_v0  ;;  %245 = vst.msk [vmem:[#allocation2 + $0x38] sm:$0xff] (!%p154_p3), %vm237_vm0, %v614_v0 }
   0xb   : > { %247 = vst.msk [vmem:[#allocation3 + $0x8] sm:$0xff] (!%p154_p3), %vm237_vm0, %v615_v31  ;;  %246 = vst.msk [vmem:[#allocation3] sm:$0xff] (!%p154_p3), %vm237_vm0, %v615_v31 }
   0xc   : > { %248 = vst.msk [vmem:[#allocation3 + $0x10] sm:$0xff] (!%p154_p3), %vm237_vm0, %v615_v31  ;;  %249 = vst.msk [vmem:[#allocation3 + $0x18] sm:$0xff] (!%p154_p3), %vm237_vm0, %v615_v31 }
   0xd   : > { %250 = vst.msk [vmem:[#allocation3 + $0x20] sm:$0xff] (!%p154_p3), %vm237_vm0, %v615_v31  ;;  %251 = vst.msk [vmem:[#allocation3 + $0x28] sm:$0xff] (!%p154_p3), %vm237_vm0, %v615_v31 }
   0xe   : > { %s751_s9 = smov (!%p199_p4, %s604_s9), 1  ;;  %252 = vst.msk [vmem:[#allocation3 + $0x30] sm:$0xff] %vm237_vm0, %v615_v31  ;;  %253 = vst.msk [vmem:[#allocation3 + $0x38] sm:$0xff] %vm237_vm0, %v615_v31  ;;  %v272_v34 = vld [vmem:[#allocation2 + $0x10] sm:$0xff]  ;;  %v270_v35 = vld [vmem:[#allocation2] sm:$0xff] }
   0xf   : > { %s561_s13 = sshll.u32 %s751_s9, 7  ;;  %v273_v40 = vld [vmem:[#allocation2 + $0x18] sm:$0xff]  ;;  %v271_v41 = vld [vmem:[#allocation2 + $0x8] sm:$0xff]  ;;  %s562_s17 = sshll.u32 %s751_s9, 6 }
  0x10   : > { %s210_s16 = scalar_lea.vmem %s743_s0, %s561_s13  ;;  %v275_v46 = vld [vmem:[#allocation2 + $0x28] sm:$0xff]  ;;  %v274_v47 = vld [vmem:[#allocation2 + $0x20] sm:$0xff]  ;;  %s680_s20 = scalar_lea.vmem %s744_s1, %s562_s17 }
  0x11   : > { %v258_v1 = vld [vmem:[%s210_s16 + $0x20] sm:$0xff]  ;;  %v259_v2 = vld [vmem:[%s210_s16 + $0x28] sm:$0xff]  ;;  %v260_v6 = vld [vmem:[%s210_s16 + $0x30] sm:$0xff]  ;;  %s711_s23 = scalar_lea.vmem %s745_s2, %s562_s17 }
  0x12   : > { %v254_v3 = vld [vmem:[%s210_s16] sm:$0xff]  ;;  %v284_v4 = vadd.f32 %v259_v2, %v258_v1  ;;  %v255_v5 = vld [vmem:[%s210_s16 + $0x8] sm:$0xff]  ;;  %v261_v7 = vld [vmem:[%s210_s16 + $0x38] sm:$0xff]  ;;  %v333_v28 = vmax.f32 %v258_v1, %v259_v2 }
  0x13   : > { %v278_v8 = vadd.f32 %v255_v5, %v254_v3  ;;  %v256_v9 = vld [vmem:[%s210_s16 + $0x10] sm:$0xff]  ;;  %v257_v10 = vld [vmem:[%s210_s16 + $0x18] sm:$0xff]  ;;  %v287_v11 = vadd.f32 %v261_v7, %v260_v6  ;;  %v262_v15 = vld [vmem:[%s210_s16 + $0x40] sm:$0xff]  ;;  %v327_v26 = vmax.f32 %v254_v3, %v255_v5  ;;  %v336_v27 = vmax.f32 %v260_v6, %v261_v7 }
  0x14   : > { %285 = vadd.xlane.f32.xlu1 %v284_v4  ;;  %v281_v12 = vadd.f32 %v257_v10, %v256_v9  ;;  %v264_v13 = vld [vmem:[%s210_s16 + $0x50] sm:$0xff]  ;;  %v265_v14 = vld [vmem:[%s210_s16 + $0x58] sm:$0xff]  ;;  %v263_v16 = vld [vmem:[%s210_s16 + $0x48] sm:$0xff]  ;;  %v330_v25 = vmax.f32 %v256_v9, %v257_v10 }
  0x15   : > { %279 = vadd.xlane.f32.xlu0 %v278_v8  ;;  %v293_v17 = vadd.f32 %v265_v14, %v264_v13  ;;  %v290_v18 = vadd.f32 %v263_v16, %v262_v15  ;;  %v268_v19 = vld [vmem:[%s210_s16 + $0x70] sm:$0xff]  ;;  %v269_v20 = vld [vmem:[%s210_s16 + $0x78] sm:$0xff]  ;;  %v266_v21 = vld [vmem:[%s210_s16 + $0x60] sm:$0xff]  ;;  %v342_v29 = vmax.f32 %v264_v13, %v265_v14  ;;  %v339_v30 = vmax.f32 %v262_v15, %v263_v16 }
  0x16   : > { %v267_v22 = vld [vmem:[%s210_s16 + $0x68] sm:$0xff]  ;;  %v299_v23 = vadd.f32 %v269_v20, %v268_v19  ;;  %v348_v32 = vmax.f32 %v268_v19, %v269_v20  ;;  %v277_v53 = vld [vmem:[#allocation2 + $0x38] sm:$0xff]  ;;  %v276_v55 = vld [vmem:[#allocation2 + $0x30] sm:$0xff] }
  0x17   : > { %v296_v24 = vadd.f32 %v267_v22, %v266_v21  ;;  %v345_v33 = vmax.f32 %v266_v21, %v267_v22  ;;  %v320_v61 = vld [vmem:[#allocation3 + $0x8] sm:$0xff]  ;;  %v319_v63 = vld [vmem:[#allocation3] sm:$0xff]  ;;  %v322_v5 = vld [vmem:[#allocation3 + $0x18] sm:$0xff] }
  0x18   : > { %288 = vadd.xlane.f32.xlu1 %v287_v11  ;;  %v321_v7 = vld [vmem:[#allocation3 + $0x10] sm:$0xff]  ;;  %v324_v13 = vld [vmem:[#allocation3 + $0x28] sm:$0xff]  ;;  %v323_v15 = vld [vmem:[#allocation3 + $0x20] sm:$0xff] }
  0x19   : > { %282 = vadd.xlane.f32.xlu0 %v281_v12  ;;  %v326_v21 = vld [vmem:[#allocation3 + $0x38] sm:$0xff] }
  0x1c   : > { %294 = vadd.xlane.f32.xlu1 %v293_v17 }
  0x1d   : > { %291 = vadd.xlane.f32.xlu0 %v290_v18 }
  0x20   : > { %300 = vadd.xlane.f32.xlu1 %v299_v23  ;;  %v325_v23 = vld [vmem:[#allocation3 + $0x30] sm:$0xff] }
  0x21   : > { %297 = vadd.xlane.f32.xlu0 %v296_v24 }
  0x24   : > { %331 = vmax.xlane.f32.xlu1 %v330_v25 }
  0x25   : > { %328 = vmax.xlane.f32.xlu0 %v327_v26 }
  0x28   : > { %337 = vmax.xlane.f32.xlu1 %v336_v27 }
  0x29   : > { %334 = vmax.xlane.f32.xlu0 %v333_v28 }
  0x2c   : > { %343 = vmax.xlane.f32.xlu1 %v342_v29 }
  0x2d   : > { %340 = vmax.xlane.f32.xlu0 %v339_v30 }
  0x30   : > { %349 = vmax.xlane.f32.xlu1 %v348_v32 }
  0x31   : > { %346 = vmax.xlane.f32.xlu0 %v345_v33 }
  0xa1   : > { %v286_v36 = vpop.xlane.xlu1 %285 }
  0xa2   : > { %v304_v37 = vadd.f32 %v286_v36, %v272_v34  ;;  %v280_v38 = vpop.xlane.xlu0 %279 }
  0xa3   : > { %v302_v39 = vadd.f32 %v280_v38, %v270_v35 }
  0xa4   : > { %313 = vst.msk [vmem:[#allocation2 + $0x10] sm:$0xff] %vm237_vm0, %v304_v37 }
  0xa5   : > { %311 = vst.msk [vmem:[#allocation2] sm:$0xff] %vm237_vm0, %v302_v39  ;;  %v289_v42 = vpop.xlane.xlu1 %288 }
  0xa6   : > { %v305_v43 = vadd.f32 %v289_v42, %v273_v40  ;;  %v283_v44 = vpop.xlane.xlu0 %282 }
  0xa7   : > { %v303_v45 = vadd.f32 %v283_v44, %v271_v41 }
  0xa8   : > { %314 = vst.msk [vmem:[#allocation2 + $0x18] sm:$0xff] %vm237_vm0, %v305_v43 }
  0xa9   : > { %312 = vst.msk [vmem:[#allocation2 + $0x8] sm:$0xff] %vm237_vm0, %v303_v45  ;;  %v295_v48 = vpop.xlane.xlu1 %294 }
  0xaa   : > { %v307_v49 = vadd.f32 %v295_v48, %v275_v46  ;;  %v292_v50 = vpop.xlane.xlu0 %291 }
  0xab   : > { %v372_v51 = vld [vmem:[#allocation2 + $0x10] sm:$0xff]  ;;  %v306_v52 = vadd.f32 %v292_v50, %v274_v47 }
  0xac   : > { %380 = vst.msk [vmem:[%s680_s20 + $0x10] sm:$0xff] %vm237_vm0, %v372_v51  ;;  %v370_v54 = vld [vmem:[#allocation2] sm:$0xff]  ;;  %316 = vst.msk [vmem:[#allocation2 + $0x28] sm:$0xff] %vm237_vm0, %v307_v49 }
  0xad   : > { %378 = vst.msk [vmem:[%s680_s20] sm:$0xff] %vm237_vm0, %v370_v54  ;;  %315 = vst.msk [vmem:[#allocation2 + $0x20] sm:$0xff] %vm237_vm0, %v306_v52  ;;  %v301_v56 = vpop.xlane.xlu1 %300 }
  0xae   : > { %v309_v57 = vadd.f32 %v301_v56, %v277_v53  ;;  %v298_v58 = vpop.xlane.xlu0 %297 }
  0xaf   : > { %v373_v59 = vld [vmem:[#allocation2 + $0x18] sm:$0xff]  ;;  %v308_v60 = vadd.f32 %v298_v58, %v276_v55 }
  0xb0   : > { %381 = vst.msk [vmem:[%s680_s20 + $0x18] sm:$0xff] %vm237_vm0, %v373_v59  ;;  %v371_v62 = vld [vmem:[#allocation2 + $0x8] sm:$0xff]  ;;  %318 = vst.msk [vmem:[#allocation2 + $0x38] sm:$0xff] %vm237_vm0, %v309_v57 }
  0xb1   : > { %379 = vst.msk [vmem:[%s680_s20 + $0x8] sm:$0xff] %vm237_vm0, %v371_v62  ;;  %317 = vst.msk [vmem:[#allocation2 + $0x30] sm:$0xff] %vm237_vm0, %v308_v60  ;;  %v332_v0 = vpop.xlane.xlu1 %331 }
  0xb2   : > { %v352_v1 = vmax.f32 %v320_v61, %v332_v0  ;;  %v329_v2 = vpop.xlane.xlu0 %328 }
  0xb3   : > { %v375_v3 = vld [vmem:[#allocation2 + $0x28] sm:$0xff]  ;;  %v351_v4 = vmax.f32 %v319_v63, %v329_v2 }
  0xb4   : > { %383 = vst.msk [vmem:[%s680_s20 + $0x28] sm:$0xff] %vm237_vm0, %v375_v3  ;;  %v374_v6 = vld [vmem:[#allocation2 + $0x20] sm:$0xff]  ;;  %360 = vst.msk [vmem:[#allocation3 + $0x8] sm:$0xff] %vm237_vm0, %v352_v1 }
  0xb5   : > { %382 = vst.msk [vmem:[%s680_s20 + $0x20] sm:$0xff] %vm237_vm0, %v374_v6  ;;  %359 = vst.msk [vmem:[#allocation3] sm:$0xff] %vm237_vm0, %v351_v4  ;;  %v338_v8 = vpop.xlane.xlu1 %337 }
  0xb6   : > { %v354_v9 = vmax.f32 %v322_v5, %v338_v8  ;;  %v335_v10 = vpop.xlane.xlu0 %334 }
  0xb7   : > { %v377_v11 = vld [vmem:[#allocation2 + $0x38] sm:$0xff]  ;;  %v353_v12 = vmax.f32 %v321_v7, %v335_v10 }
  0xb8   : > { %385 = vst.msk [vmem:[%s680_s20 + $0x38] sm:$0xff] %vm237_vm0, %v377_v11  ;;  %v376_v14 = vld [vmem:[#allocation2 + $0x30] sm:$0xff]  ;;  %362 = vst.msk [vmem:[#allocation3 + $0x18] sm:$0xff] %vm237_vm0, %v354_v9 }
  0xb9   : > { %384 = vst.msk [vmem:[%s680_s20 + $0x30] sm:$0xff] %vm237_vm0, %v376_v14  ;;  %361 = vst.msk [vmem:[#allocation3 + $0x10] sm:$0xff] %vm237_vm0, %v353_v12  ;;  %v344_v16 = vpop.xlane.xlu1 %343 }
  0xba   : > { %v356_v17 = vmax.f32 %v324_v13, %v344_v16  ;;  %v341_v18 = vpop.xlane.xlu0 %340 }
  0xbb   : > { %v387_v19 = vld [vmem:[#allocation3 + $0x8] sm:$0xff]  ;;  %v355_v20 = vmax.f32 %v323_v15, %v341_v18 }
  0xbc   : > { %395 = vst.msk [vmem:[%s711_s23 + $0x8] sm:$0xff] %vm237_vm0, %v387_v19  ;;  %v386_v22 = vld [vmem:[#allocation3] sm:$0xff]  ;;  %364 = vst.msk [vmem:[#allocation3 + $0x28] sm:$0xff] %vm237_vm0, %v356_v17 }
  0xbd   : > { %394 = vst.msk [vmem:[%s711_s23] sm:$0xff] %vm237_vm0, %v386_v22  ;;  %363 = vst.msk [vmem:[#allocation3 + $0x20] sm:$0xff] %vm237_vm0, %v355_v20  ;;  %v350_v24 = vpop.xlane.xlu1 %349 }
  0xbe   : > { %v358_v25 = vmax.f32 %v326_v21, %v350_v24  ;;  %v347_v26 = vpop.xlane.xlu0 %346 }
  0xbf   : > { %v389_v27 = vld [vmem:[#allocation3 + $0x18] sm:$0xff]  ;;  %v357_v28 = vmax.f32 %v325_v23, %v347_v26 }
  0xc0   : > { %397 = vst.msk [vmem:[%s711_s23 + $0x18] sm:$0xff] %vm237_vm0, %v389_v27  ;;  %v388_v29 = vld [vmem:[#allocation3 + $0x10] sm:$0xff]  ;;  %366 = vst.msk [vmem:[#allocation3 + $0x38] sm:$0xff] %vm237_vm0, %v358_v25 }
  0xc1   : > { %396 = vst.msk [vmem:[%s711_s23 + $0x10] sm:$0xff] %vm237_vm0, %v388_v29  ;;  %365 = vst.msk [vmem:[#allocation3 + $0x30] sm:$0xff] %vm237_vm0, %v357_v28 }
  0xc3   : > { %v391_v30 = vld [vmem:[#allocation3 + $0x28] sm:$0xff] }
  0xc4   : > { %399 = vst.msk [vmem:[%s711_s23 + $0x28] sm:$0xff] %vm237_vm0, %v391_v30  ;;  %v390_v31 = vld [vmem:[#allocation3 + $0x20] sm:$0xff] }
  0xc5   : > { %398 = vst.msk [vmem:[%s711_s23 + $0x20] sm:$0xff] %vm237_vm0, %v390_v31 }
  0xc7   : > { %v393_v32 = vld [vmem:[#allocation3 + $0x38] sm:$0xff] }
  0xc8   : > { %401 = vst.msk [vmem:[%s711_s23 + $0x38] sm:$0xff] %vm237_vm0, %v393_v32  ;;  %v392_v33 = vld [vmem:[#allocation3 + $0x30] sm:$0xff] }
  0xc9   : > { %400 = vst.msk [vmem:[%s711_s23 + $0x30] sm:$0xff] %vm237_vm0, %v392_v33 }
  0xca PF: > { %s13_s11 = sadd.s32 1, %s612_s11   ;;  %s746_s9 = smov %s608_s10 }
  0xcb   : > { %p10_p5 = scmp.ge.s32.totalorder %s13_s11, 4   ;;  %s747_s10 = smov %s749_s12 }
  0xcd   :  { %12 = sbr.rel (!%p10_p5) target bundleno = 2 (0x2), region = 74 }

</bundles_post_ra>
